<compile_context>
chip_gen: v7x
topology: tpu7x:2x2x1
jax: 0.10.0
libtpu: 0.0.40
codegen_flags: <defaults>
</compile_context>

<pallas_src>
import functools

import jax
import jax.numpy as jnp
from jax.experimental import pallas as pl
from jax.experimental.pallas import tpu as pltpu

ALPHA = 0.1   # SSGConv alpha from the module (K defaults to 1)


def _round_up(v: int, m: int) -> int:
    return (v + m - 1) // m * m


def _cdiv(a: int, b: int) -> int:
    return -(-a // b)


def ssgconv_nn_kernel(a_ref, xw1_ref, b1_ref, w2_ref, b2_ref, out_ref, acc_ref):
    """One (row-tile, K-tile) step of A_eff @ XW1 with fused epilogue."""
    k = pl.program_id(1)

    @pl.when(k == 0)
    def _():
        acc_ref[...] = jnp.zeros_like(acc_ref)

    # (TM, TK) bf16 @ (TK, HID_PAD) bf16 -> f32 accumulation on the MXU.
    acc_ref[...] += jnp.dot(a_ref[...], xw1_ref[...],
                            preferred_element_type=jnp.float32)

    @pl.when(k == pl.num_programs(1) - 1)
    def _():
        # Epilogue in f32: bias, ReLU, then the small output matmul (bf16 MXU).
        h1 = acc_ref[...] + b1_ref[...]
        z = jnp.maximum(h1, 0.0).astype(jnp.bfloat16)
        out = (jnp.dot(z, w2_ref[...], preferred_element_type=jnp.float32)
               + b2_ref[...])
        out_ref[...] = out.astype(out_ref.dtype)


def gcn_norm_dense(edge_index, edge_weight, num_nodes, dtype):
    """Plain-JAX glue: dense D^{-1/2}(A+I)D^{-1/2} with A[target, source]."""
    src = edge_index[0]
    dst = edge_index[1]
    loop = jnp.arange(num_nodes, dtype=edge_index.dtype)
    src = jnp.concatenate([src, loop])
    dst = jnp.concatenate([dst, loop])
    ew = jnp.concatenate([edge_weight.astype(dtype),
                          jnp.ones((num_nodes,), dtype)])
    a = jnp.zeros((num_nodes, num_nodes), dtype).at[dst, src].add(ew)
    deg = a.sum(axis=1)
    dinv = jnp.where(deg > 0, jax.lax.rsqrt(deg), 0.0)
    return dinv[:, None] * a * dinv[None, :]


@functools.partial(jax.jit, static_argnames=("tm", "tk"))
def ssgconv_nn(x, edge_index, edge_weight, w1, b1, w2, b2, *, tm=256, tk=2048):
    """Forward of SSGConvNN.

    x:   (N, in_channels) node features
    w1:  (in_channels, hidden_channels)   [pre-transposed vs. torch Linear]
    b1:  (hidden_channels,)
    w2:  (hidden_channels, out_channels)  [pre-transposed vs. torch Linear]
    b2:  (out_channels,)
    """
    n, _ = x.shape
    hid = w1.shape[1]
    out_ch = w2.shape[1]

    hid_pad = _round_up(hid, 128)          # lane-dense accumulator / epilogue
    out_pad = _round_up(out_ch, 128)       # lane-dense output stores

    # Row (M) tiling: sublane-aligned, split evenly to minimize padding.
    n_m8 = _round_up(n, 8)
    nm_tiles = _cdiv(n_m8, tm)
    tm_eff = _round_up(_cdiv(n_m8, nm_tiles), 8)
    n_m_pad = tm_eff * nm_tiles

    # Contraction (K) tiling: lane-aligned, split evenly to minimize padding.
    n_k128 = _round_up(n, 128)
    nk_tiles = _cdiv(n_k128, tk)
    tk_eff = _round_up(_cdiv(n_k128, nk_tiles), 128)
    n_k_pad = tk_eff * nk_tiles

    # Fold alpha and the SSGConv Linear into the propagation:
    #   h @ W1 = (alpha*I + (1-alpha)*A_norm) @ (x @ W1)
    a_norm = gcn_norm_dense(edge_index, edge_weight, n, jnp.float32)
    a_eff = (1.0 - ALPHA) * a_norm + ALPHA * jnp.eye(n, dtype=jnp.float32)
    a_bf = jnp.zeros((n_m_pad, n_k_pad), jnp.bfloat16).at[:n, :n].set(
        a_eff.astype(jnp.bfloat16))

    xw1 = x.astype(jnp.float32) @ w1.astype(jnp.float32)     # (N, hid), tiny
    xw1_bf = jnp.zeros((n_k_pad, hid_pad), jnp.bfloat16).at[:n, :hid].set(
        xw1.astype(jnp.bfloat16))

    b1_pad = jnp.zeros((1, hid_pad), jnp.float32).at[:, :hid].set(
        b1.reshape(1, hid).astype(jnp.float32))
    w2_pad = jnp.zeros((hid_pad, out_pad), jnp.bfloat16).at[:hid, :out_ch].set(
        w2.astype(jnp.bfloat16))
    b2_pad = jnp.zeros((1, out_pad), jnp.float32).at[:, :out_ch].set(
        b2.reshape(1, out_ch).astype(jnp.float32))

    grid = (nm_tiles, nk_tiles)            # reduction axis last
    out = pl.pallas_call(
        ssgconv_nn_kernel,
        out_shape=jax.ShapeDtypeStruct((n_m_pad, out_pad), x.dtype),
        grid=grid,
        in_specs=[
            pl.BlockSpec((tm_eff, tk_eff), lambda i, k: (i, k)),     # A_eff tile
            pl.BlockSpec((tk_eff, hid_pad), lambda i, k: (k, 0)),    # XW1 K-tile
            pl.BlockSpec((1, hid_pad), lambda i, k: (0, 0)),         # b1 (resident)
            pl.BlockSpec((hid_pad, out_pad), lambda i, k: (0, 0)),   # W2 (resident)
            pl.BlockSpec((1, out_pad), lambda i, k: (0, 0)),         # b2 (resident)
        ],
        out_specs=pl.BlockSpec((tm_eff, out_pad), lambda i, k: (i, 0)),
        scratch_shapes=[pltpu.VMEM((tm_eff, hid_pad), jnp.float32)],  # accumulator
        compiler_params=pltpu.CompilerParams(
            dimension_semantics=("parallel", "arbitrary"),
            # Safe on every generation (<= 64 MiB v7x VMEM); per-step footprint
            # with the default tiles is only a few MiB thanks to K-tiling.
            vmem_limit_bytes=48 * 1024 * 1024,
        ),
    )(a_bf, xw1_bf, b1_pad, w2_pad, b2_pad)

    return out[:n, :out_ch]


if __name__ == "__main__":
    # Small, deterministic synthetic problem.
    N = 16              # number of nodes
    IN_CH = 8           # in_channels
    HID_CH = 32         # hidden_channels
    OUT_CH = 4          # out_channels
    E = 40              # number of edges

    key = jax.random.PRNGKey(0)
    kx, ks, kd, kw, k1, k2, k3, k4 = jax.random.split(key, 8)

    x = jax.random.normal(kx, (N, IN_CH), jnp.float32)
    edge_index = jnp.stack([
        jax.random.randint(ks, (E,), 0, N),
        jax.random.randint(kd, (E,), 0, N),
    ]).astype(jnp.int32)
    edge_weight = jax.random.uniform(kw, (E,), jnp.float32, 0.1, 1.0)

    # Deterministic parameter init (shapes from the module's __init__).
    w1 = jax.random.normal(k1, (IN_CH, HID_CH), jnp.float32) * 0.1   # SSGConv.lin
    b1 = jax.random.normal(k2, (HID_CH,), jnp.float32) * 0.1
    w2 = jax.random.normal(k3, (HID_CH, OUT_CH), jnp.float32) * 0.1  # nn.Linear
    b2 = jax.random.normal(k4, (OUT_CH,), jnp.float32) * 0.1

    out = ssgconv_nn(x, edge_index, edge_weight, w1, b1, w2, b2)
    jax.block_until_ready(out)

    # Pure-JAX reference, applying the same bf16 roundings the kernel feeds to
    # the MXU (A_eff, XW1, z, W2 rounded to bf16; all math in f32).
    a_f32 = gcn_norm_dense(edge_index, edge_weight, N, jnp.float32)
    a_eff = (1.0 - ALPHA) * a_f32 + ALPHA * jnp.eye(N, dtype=jnp.float32)
    a_bf = a_eff.astype(jnp.bfloat16).astype(jnp.float32)
    xw1_bf = (x @ w1).astype(jnp.bfloat16).astype(jnp.float32)
    h1 = a_bf @ xw1_bf + b1
    z = jnp.maximum(h1, 0.0).astype(jnp.bfloat16).astype(jnp.float32)
    ref = z @ w2.astype(jnp.bfloat16).astype(jnp.float32) + b2

    assert out.shape == (N, OUT_CH)
    assert jnp.allclose(out, ref, atol=5e-3, rtol=5e-3), (
        float(jnp.max(jnp.abs(out - ref))))

    print("KERNEL_OK")
</pallas_src>

<mosaic_0001>
module attributes {stable_mosaic.version = 11 : i64} {
  func.func @ssgconv_nn_kernel(%arg0: i32, %arg1: i32, %arg2: memref<16x128xbf16, #tpu.memory_space<vmem>>, %arg3: memref<128x128xbf16, #tpu.memory_space<vmem>>, %arg4: memref<1x128xf32, #tpu.memory_space<vmem>>, %arg5: memref<128x128xbf16, #tpu.memory_space<vmem>>, %arg6: memref<1x128xf32, #tpu.memory_space<vmem>>, %arg7: memref<16x128xf32, #tpu.memory_space<vmem>>, %arg8: memref<16x128xf32, #tpu.memory_space<vmem>>) attributes {dimension_semantics = [#tpu.dimension_semantics<parallel>, #tpu.dimension_semantics<arbitrary>], iteration_bounds = array<i64: 1, 1>, scalar_prefetch = 0 : i64, scratch_operands = 1 : i64, tpu.core_type = #tpu.core_type<tc>, window_params = [{transform_indices = @transform_0, window_bounds = array<i64: 16, 128>}, {transform_indices = @transform_1, window_bounds = array<i64: 128, 128>}, {pipeline_mode = #tpu.pipeline_mode<synchronous>, transform_indices = @transform_2, window_bounds = array<i64: 1, 128>}, {pipeline_mode = #tpu.pipeline_mode<synchronous>, transform_indices = @transform_3, window_bounds = array<i64: 128, 128>}, {pipeline_mode = #tpu.pipeline_mode<synchronous>, transform_indices = @transform_4, window_bounds = array<i64: 1, 128>}, {transform_indices = @transform_5, window_bounds = array<i64: 16, 128>}]} {
    %c0_i32 = arith.constant 0 : i32
    %0 = arith.cmpi eq, %arg1, %c0_i32 : i32
    %1 = arith.extui %0 : i1 to i32
    %c0_i32_0 = arith.constant 0 : i32
    %2 = arith.cmpi ne, %1, %c0_i32_0 : i32
    scf.if %2 {
      %cst_10 = arith.constant 0.000000e+00 : f32
      %12 = vector.broadcast %cst_10 : f32 to vector<16x128xf32>
      %c0_11 = arith.constant 0 : index
      %c0_12 = arith.constant 0 : index
      %13 = vector.load %arg8[%c0_11, %c0_12] : memref<16x128xf32, #tpu.memory_space<vmem>>, vector<16x128xf32>
      tpu.vector_store %arg8[%c0_11, %c0_12], %12 {strides = array<i32>} : memref<16x128xf32, #tpu.memory_space<vmem>>, vector<16x128xf32>,
    } else {
    }
    %c0 = arith.constant 0 : index
    %c0_1 = arith.constant 0 : index
    %3 = vector.load %arg8[%c0, %c0_1] : memref<16x128xf32, #tpu.memory_space<vmem>>, vector<16x128xf32>
    %c0_2 = arith.constant 0 : index
    %c0_3 = arith.constant 0 : index
    %4 = vector.load %arg2[%c0_2, %c0_3] : memref<16x128xbf16, #tpu.memory_space<vmem>>, vector<16x128xbf16>
    %c0_4 = arith.constant 0 : index
    %c0_5 = arith.constant 0 : index
    %5 = vector.load %arg3[%c0_4, %c0_5] : memref<128x128xbf16, #tpu.memory_space<vmem>>, vector<128x128xbf16>
    %cst = arith.constant dense<0.000000e+00> : vector<16x128xf32>
    %6 = tpu.matmul %4, %5, %cst {dimension_numbers = #tpu.dot_dimension_numbers<[1], [0], [0], [1], [0, 0, 1, 1], [], []>} : vector<16x128xbf16>, vector<128x128xbf16>, vector<16x128xf32> -> vector<16x128xf32>
    %7 = arith.addf %3, %6 : vector<16x128xf32>
    %c0_6 = arith.constant 0 : index
    %c0_7 = arith.constant 0 : index
    %8 = vector.load %arg8[%c0_6, %c0_7] : memref<16x128xf32, #tpu.memory_space<vmem>>, vector<16x128xf32>
    tpu.vector_store %arg8[%c0_6, %c0_7], %7 {strides = array<i32>} : memref<16x128xf32, #tpu.memory_space<vmem>>, vector<16x128xf32>,
    %c0_i32_8 = arith.constant 0 : i32
    %9 = arith.cmpi eq, %arg1, %c0_i32_8 : i32
    %10 = arith.extui %9 : i1 to i32
    %c0_i32_9 = arith.constant 0 : i32
    %11 = arith.cmpi ne, %10, %c0_i32_9 : i32
    scf.if %11 {
      %c0_10 = arith.constant 0 : index
      %c0_11 = arith.constant 0 : index
      %12 = vector.load %arg8[%c0_10, %c0_11] : memref<16x128xf32, #tpu.memory_space<vmem>>, vector<16x128xf32>
      %c0_12 = arith.constant 0 : index
      %c0_13 = arith.constant 0 : index
      %13 = vector.load %arg4[%c0_12, %c0_13] : memref<1x128xf32, #tpu.memory_space<vmem>>, vector<1x128xf32>
      %14 = vector.broadcast %13 : vector<1x128xf32> to vector<16x128xf32>
      %15 = arith.addf %12, %14 : vector<16x128xf32>
      %cst_14 = arith.constant 0.000000e+00 : f32
      %16 = vector.broadcast %cst_14 : f32 to vector<16x128xf32>
      %17 = arith.maximumf %15, %16 : vector<16x128xf32>
      %18 = arith.truncf %17 : vector<16x128xf32> to vector<16x128xbf16>
      %c0_15 = arith.constant 0 : index
      %c0_16 = arith.constant 0 : index
      %19 = vector.load %arg5[%c0_15, %c0_16] : memref<128x128xbf16, #tpu.memory_space<vmem>>, vector<128x128xbf16>
      %cst_17 = arith.constant dense<0.000000e+00> : vector<16x128xf32>
      %20 = tpu.matmul %18, %19, %cst_17 {dimension_numbers = #tpu.dot_dimension_numbers<[1], [0], [0], [1], [0, 0, 1, 1], [], []>} : vector<16x128xbf16>, vector<128x128xbf16>, vector<16x128xf32> -> vector<16x128xf32>
      %c0_18 = arith.constant 0 : index
      %c0_19 = arith.constant 0 : index
      %21 = vector.load %arg6[%c0_18, %c0_19] : memref<1x128xf32, #tpu.memory_space<vmem>>, vector<1x128xf32>
      %22 = vector.broadcast %21 : vector<1x128xf32> to vector<16x128xf32>
      %23 = arith.addf %20, %22 : vector<16x128xf32>
      %c0_20 = arith.constant 0 : index
      %c0_21 = arith.constant 0 : index
      %24 = vector.load %arg7[%c0_20, %c0_21] : memref<16x128xf32, #tpu.memory_space<vmem>>, vector<16x128xf32>
      tpu.vector_store %arg7[%c0_20, %c0_21], %23 {strides = array<i32>} : memref<16x128xf32, #tpu.memory_space<vmem>>, vector<16x128xf32>,
    } else {
    }
    return
  }
  func.func @transform_0(%arg0: i32, %arg1: i32) -> (i32, i32) {
    %c0_i32 = arith.constant 0 : i32
    return %arg0, %arg1 : i32, i32
  }
  func.func @transform_1(%arg0: i32, %arg1: i32) -> (i32, i32) {
    %c0_i32 = arith.constant 0 : i32
    %c0_i32_0 = arith.constant 0 : i32
    return %arg1, %c0_i32 : i32, i32
  }
  func.func @transform_2(%arg0: i32, %arg1: i32) -> (i32, i32) {
    %c0_i32 = arith.constant 0 : i32
    %c0_i32_0 = arith.constant 0 : i32
    %c0_i32_1 = arith.constant 0 : i32
    return %c0_i32, %c0_i32_0 : i32, i32
  }
  func.func @transform_3(%arg0: i32, %arg1: i32) -> (i32, i32) {
    %c0_i32 = arith.constant 0 : i32
    %c0_i32_0 = arith.constant 0 : i32
    %c0_i32_1 = arith.constant 0 : i32
    return %c0_i32, %c0_i32_0 : i32, i32
  }
  func.func @transform_4(%arg0: i32, %arg1: i32) -> (i32, i32) {
    %c0_i32 = arith.constant 0 : i32
    %c0_i32_0 = arith.constant 0 : i32
    %c0_i32_1 = arith.constant 0 : i32
    return %c0_i32, %c0_i32_0 : i32, i32
  }
  func.func @transform_5(%arg0: i32, %arg1: i32) -> (i32, i32) {
    %c0_i32 = arith.constant 0 : i32
    %c0_i32_0 = arith.constant 0 : i32
    return %arg0, %c0_i32 : i32, i32
  }
}

</mosaic_0001>

<bundles_post_ra>
// kernel: ssgconv_nn.1
= control target key start
LH: loop header
LB: loop body
LE: loop exit
PB: predicated region body
PF: predicated region fallthrough
CT: control target
= control target key end

     0   :  { %v377_v0 = vmov 0.0   ;;  %vm378_vm0 = vmmov 0   ;;  %s472_s1 = inlined_call_operand.vmem [shape: bf16[128,128], index: 1, kind: input, shape index: {}]   ;;  %s473_s3 = inlined_call_operand.vmem [shape: bf16[128,128], index: 3, kind: input, shape index: {}]   ;;  %s474_s0 = inlined_call_operand.vmem [shape: bf16[16,128], index: 0, kind: input, shape index: {}]   ;;  %s475_s2 = inlined_call_operand.vmem [shape: f32[1,128], index: 2, kind: input, shape index: {}]   ;;  %s476_s4 = inlined_call_operand.vmem [shape: f32[1,128], index: 4, kind: input, shape index: {}]   ;;  %s477_s5 = inlined_call_operand.vmem [shape: f32[16,128], index: 5, kind: output, shape index: {}]  }
   0x1   :  { %318 = vmatprep.subr.bf16.mxu0 %v377_v0  ;;  %v360_v1 = vld [vmem:[%s472_s1] sm:$0xff]   ;;  %334 = vmatprep.mubr.msk.bf16.mxu0 %vm378_vm0, %v377_v0  ;;  %v361_v2 = vld [vmem:[%s472_s1 + $0x8] sm:$0xff]   ;;  %v362_v3 = vld [vmem:[%s472_s1 + $0x10] sm:$0xff]  }
   0x2   :  { %338 = vmatprep.subr.bf16.mxu1 %v377_v0  ;;  %354 = vmatprep.mubr.msk.bf16.mxu1 %vm378_vm0, %v377_v0  ;;  %v369_v4 = vld [vmem:[%s473_s3] sm:$0xff]   ;;  %v363_v5 = vld [vmem:[%s472_s1 + $0x18] sm:$0xff]   ;;  %v370_v6 = vld [vmem:[%s473_s3 + $0x8] sm:$0xff]  }
   0x3   :  { %319 = vmatpush3.bf16.msra.mxu0 %v360_v1  ;;  %339 = vmatpush3.bf16.msra.mxu1 %v369_v4  ;;  %v364_v7 = vld [vmem:[%s472_s1 + $0x20] sm:$0xff]   ;;  %v371_v8 = vld [vmem:[%s473_s3 + $0x10] sm:$0xff]   ;;  %v365_v9 = vld [vmem:[%s472_s1 + $0x28] sm:$0xff]  }
   0x4   :  { %320 = vmatprep.subr.bf16.mxu0 %v377_v0  ;;  %340 = vmatprep.subr.bf16.mxu1 %v377_v0  ;;  %v372_v10 = vld [vmem:[%s473_s3 + $0x18] sm:$0xff]   ;;  %v366_v11 = vld [vmem:[%s472_s1 + $0x30] sm:$0xff]   ;;  %v373_v12 = vld [vmem:[%s473_s3 + $0x20] sm:$0xff]  }
   0x5   :  { %v367_v13 = vld [vmem:[%s472_s1 + $0x38] sm:$0xff]   ;;  %v374_v14 = vld [vmem:[%s473_s3 + $0x28] sm:$0xff]   ;;  %v368_v15 = vld [vmem:[%s474_s0] sm:$0xff]  }
   0x6   :  { %v375_v16 = vld [vmem:[%s473_s3 + $0x30] sm:$0xff]   ;;  %v376_v17 = vld [vmem:[%s473_s3 + $0x38] sm:$0xff]   ;;  %v290_v18 = vld [vmem:[%s475_s2] ss:$0 sm:$0xff] }
   0x7   :  { %321 = vmatpush3.bf16.msra.mxu0 %v361_v2  ;;  %341 = vmatpush3.bf16.msra.mxu1 %v370_v6  ;;  %v291_v28 = vld [vmem:[%s476_s4] ss:$0 sm:$0xff] }
   0x8   :  { %322 = vmatprep.subr.bf16.mxu0 %v377_v0  ;;  %342 = vmatprep.subr.bf16.mxu1 %v377_v0 }
   0xb   :  { %323 = vmatpush3.bf16.msra.mxu0 %v362_v3  ;;  %343 = vmatpush3.bf16.msra.mxu1 %v371_v8 }
   0xc   :  { %324 = vmatprep.subr.bf16.mxu0 %v377_v0  ;;  %344 = vmatprep.subr.bf16.mxu1 %v377_v0 }
   0xf   :  { %325 = vmatpush3.bf16.msra.mxu0 %v363_v5  ;;  %345 = vmatpush3.bf16.msra.mxu1 %v372_v10 }
  0x10   :  { %326 = vmatprep.subr.bf16.mxu0 %v377_v0  ;;  %346 = vmatprep.subr.bf16.mxu1 %v377_v0 }
  0x13   :  { %327 = vmatpush3.bf16.msra.mxu0 %v364_v7  ;;  %347 = vmatpush3.bf16.msra.mxu1 %v373_v12 }
  0x14   :  { %328 = vmatprep.subr.bf16.mxu0 %v377_v0  ;;  %348 = vmatprep.subr.bf16.mxu1 %v377_v0 }
  0x17   :  { %329 = vmatpush3.bf16.msra.mxu0 %v365_v9  ;;  %349 = vmatpush3.bf16.msra.mxu1 %v374_v14 }
  0x18   :  { %330 = vmatprep.subr.bf16.mxu0 %v377_v0  ;;  %350 = vmatprep.subr.bf16.mxu1 %v377_v0 }
  0x1b   :  { %331 = vmatpush3.bf16.msra.mxu0 %v366_v11  ;;  %351 = vmatpush3.bf16.msra.mxu1 %v375_v16 }
  0x1c   :  { %332 = vmatprep.subr.bf16.mxu0 %v377_v0  ;;  %352 = vmatprep.subr.bf16.mxu1 %v377_v0 }
  0x1f   :  { %333 = vmatpush3.bf16.msra.mxu0 %v367_v13  ;;  %353 = vmatpush3.bf16.msra.mxu1 %v376_v17 }
  0x22   :  { %335 = vmatmul.mubr.bf16.vlgmr.msra.gmra.mrb[0].mxu0 %v368_v15 }
  0xf5   :  { %v135_v19 = vpop.f32.mrb[0].mxu0 }
  0xf6   :  { %v158_v20 = vadd.f32 %v290_v18, %v135_v19  ;;  %v336_v21 = vpop.f32.mrb[1].mxu0 }
  0xf7   :  { %v138_v22 = vpop.f32.mrb[2].mxu0 }
  0xf8   :  { %v159_v23 = vadd.f32 %v290_v18, %v138_v22  ;;  %v337_v24 = vpop.f32.mrb[3].mxu0  ;;  %v160_v25 = vmax.f32 %v158_v20, 0.0 }
  0xfa   :  { %v161_v26 = vmax.f32 %v159_v23, 0.0 }
  0xfc   :  { %v162_v27 = vpack.c.bf16 %v161_v26, %v160_v25 }
  0xfe   :  { %355 = vmatmul.mubr.bf16.vlgmr.msra.gmra.mrb[0].mxu1 %v162_v27 }
 0x1d1   :  { %v268_v29 = vpop.f32.mrb[0].mxu1 }
 0x1d2   :  { %v269_v30 = vadd.f32 %v291_v28, %v268_v29  ;;  %v356_v31 = vpop.f32.mrb[1].mxu1 }
 0x1d3   :  { %v271_v32 = vpop.f32.mrb[2].mxu1 }
 0x1d4   :  { %275 = vst [vmem:[%s477_s5] sm:$0xff] %v269_v30  ;;  %v272_v33 = vadd.f32 %v291_v28, %v271_v32  ;;  %v357_v34 = vpop.f32.mrb[3].mxu1 }
 0x1d6   :  { %276 = vst [vmem:[%s477_s5 + $0x8] sm:$0xff] %v272_v33 }

</bundles_post_ra>
